<compile_context>
chip_gen: v6e
topology: v6e:2x2x1
jax: 0.10.0
libtpu: 0.0.40
codegen_flags: <defaults>
</compile_context>

<pallas_src>
import jax
import jax.numpy as jnp
from jax import lax
from jax.experimental import pallas as pl
from jax.experimental.pallas import tpu as pltpu


def channel_attention_kernel(x_ref, w1_ref, b1_ref, w2at_ref, w2bt_ref, b2_ref, o_ref):
    # x block: (Bn, C, HW) -- HW on the lane axis, C on sublanes.
    x = x_ref[...]
    hw = x.shape[-1]

    # Global average / max pooling over spatial positions (lane reduction).
    # f32 accumulation without materializing an f32 copy of the whole block.
    avg = jnp.sum(x, axis=-1, dtype=jnp.float32) * (1.0 / hw)   # (Bn, C)
    mx = jnp.max(x, axis=-1).astype(jnp.float32)                # (Bn, C)

    # conv1 (shared) + ReLU.  w1 is (hidden, C); contract C with C (A @ B^T).
    w1 = w1_ref[...]                                  # (hidden, C)
    b1 = b1_ref[...]                                  # (1, hidden)
    dims = (((1,), (1,)), ((), ()))
    avg_h = jnp.maximum(
        lax.dot_general(avg, w1, dims, preferred_element_type=jnp.float32) + b1, 0.0)
    max_h = jnp.maximum(
        lax.dot_general(mx, w1, dims, preferred_element_type=jnp.float32) + b1, 0.0)

    # conv2 on cat([avg_h, max_h]) == avg_h @ W2a^T + max_h @ W2b^T  (+ bias).
    # NOTE: these tiny matmuls underfill the MXU, but their FLOPs are
    # negligible; the kernel lives on HBM streaming, not MXU utilization.
    logits = (jnp.dot(avg_h, w2at_ref[...], preferred_element_type=jnp.float32)
              + jnp.dot(max_h, w2bt_ref[...], preferred_element_type=jnp.float32)
              + b2_ref[...])                          # (Bn, C)
    wts = jax.nn.sigmoid(logits)                      # (Bn, C), f32

    # Scale every spatial position of every channel (lane-broadcast multiply)
    # in the native dtype -- no block-sized f32 temporary.
    o_ref[...] = x * wts.astype(x.dtype)[:, :, None]


def _tpu_generation_params():
    """Best-effort hardware query: (vmem_capacity_bytes, tensorcores_per_chip)."""
    vmem_bytes = 128 << 20
    cores_per_chip = 1
    try:
        info = pltpu.get_tpu_info()
        vmem_bytes = int(getattr(info, "vmem_capacity_bytes", vmem_bytes))
    except Exception:
        pass
    try:
        kind = jax.devices()[0].device_kind.lower()
        if "v7" in kind:
            cores_per_chip = 2
    except Exception:
        pass
    # 64-MiB-class VMEM parts (v7x) have 2 TensorCores per chip.
    if vmem_bytes <= (64 << 20):
        cores_per_chip = max(cores_per_chip, 2)
    return vmem_bytes, cores_per_chip


def channel_attention(x_nchw, w1, b1, w2, b2, *, block_bytes_target=None):
    """x_nchw: (N, C, H, W); w1: (hidden, C, 1, 1); b1: (hidden,);
    w2: (C, 2*hidden, 1, 1); b2: (C,). Returns (N, C, H, W)."""
    N, C, H, W = x_nchw.shape
    hidden = w1.shape[0]
    HW = H * W
    itemsize = x_nchw.dtype.itemsize

    vmem_bytes, cores_per_chip = _tpu_generation_params()
    if block_bytes_target is None:
        # HBM-bound kernel: aim for ~VMEM/12 per block (~10 MiB on 128-MiB
        # v5e/v6e, ~5 MiB on 64-MiB v7x) -> near roofline, few grid steps.
        block_bytes_target = vmem_bytes // 12

    # Pure metadata reshape -- no HBM transpose.
    x_k = x_nchw.reshape(N, C, HW)

    # Flatten 1x1 conv weights; all weight operands have trailing dim C.
    w1m = w1.reshape(hidden, C).astype(jnp.float32)           # (hidden, C)
    w2m = w2.reshape(C, 2 * hidden).astype(jnp.float32)
    w2at = jnp.transpose(w2m[:, :hidden])                     # (hidden, C)  avg branch
    w2bt = jnp.transpose(w2m[:, hidden:])                     # (hidden, C)  max branch
    b1r = b1.reshape(1, hidden).astype(jnp.float32)
    b2r = b2.reshape(1, C).astype(jnp.float32)

    # Choose samples-per-block: largest divisor of N whose block fits the
    # target.  Single-TC chips (v5e/v6e) take the largest block; v7x requires
    # >= 2 blocks per TensorCore (>= 4 grid steps) when N allows, so the
    # per-core pipeline overlaps DMA with compute.
    per_sample_bytes = C * HW * itemsize
    min_steps = 1 if cores_per_chip <= 1 else min(N, 2 * cores_per_chip)
    bn = None
    for cand in range(N, 0, -1):
        if N % cand != 0:
            continue
        if cand * per_sample_bytes > block_bytes_target:
            continue
        if (N // cand) < min_steps:
            continue
        bn = cand
        break
    if bn is None:
        # A single sample already exceeds the target block size.
        # TODO(synk): switch to the two-phase (stats pass + scale pass) kernel.
        bn = 1

    block_bytes = bn * per_sample_bytes
    weight_bytes = 4 * (w1m.size + w2at.size + w2bt.size + b1r.size + b2r.size)
    # Double-buffered input + output blocks, one block-sized scale temporary,
    # double-buffered (tiny) weights, plus slack.
    vmem_need = 6 * block_bytes + 2 * weight_bytes + (4 << 20)
    vmem_cap = min(int(vmem_bytes * 0.78), 100 << 20)
    vmem_limit = max(min(vmem_need, vmem_cap), 16 << 20)

    cost = pl.CostEstimate(
        flops=int(3 * N * C * HW + 8 * N * C * hidden),
        transcendentals=int(N * C),
        bytes_accessed=int(2 * N * C * HW * itemsize + weight_bytes),
    )

    out = pl.pallas_call(
        channel_attention_kernel,
        out_shape=jax.ShapeDtypeStruct((N, C, HW), x_nchw.dtype),
        grid_spec=pltpu.PrefetchScalarGridSpec(
            num_scalar_prefetch=0,
            grid=(N // bn,),
            in_specs=[
                pl.BlockSpec((bn, C, HW), lambda n: (n, 0, 0)),
                pl.BlockSpec((hidden, C), lambda n: (0, 0)),
                pl.BlockSpec((1, hidden), lambda n: (0, 0)),
                pl.BlockSpec((hidden, C), lambda n: (0, 0)),
                pl.BlockSpec((hidden, C), lambda n: (0, 0)),
                pl.BlockSpec((1, C), lambda n: (0, 0)),
            ],
            out_specs=pl.BlockSpec((bn, C, HW), lambda n: (n, 0, 0)),
        ),
        compiler_params=pltpu.CompilerParams(
            dimension_semantics=("parallel",),
            vmem_limit_bytes=int(vmem_limit),
        ),
        cost_estimate=cost,
    )(x_k, w1m, b1r, w2at, w2bt, b2r)

    # Pure metadata reshape back to NCHW.
    return out.reshape(N, C, H, W)


def reference(x, w1, b1, w2, b2):
    """Pure-JAX reference matching the PyTorch forward exactly."""
    avg = jnp.mean(x, axis=(2, 3), keepdims=True)
    mx = jnp.max(x, axis=(2, 3), keepdims=True)

    def conv1x1(inp, w, b):
        return (jnp.einsum('ncij,ocij->noij', inp, w)
                + b.reshape(1, -1, 1, 1))

    a = jax.nn.relu(conv1x1(avg, w1, b1))
    m = jax.nn.relu(conv1x1(mx, w1, b1))
    cat = jnp.concatenate([a, m], axis=1)
    wts = jax.nn.sigmoid(conv1x1(cat, w2, b2))
    return x * wts


if __name__ == "__main__":
    N, C, H, W = 2, 32, 16, 16
    reduction_ratio = 16
    hidden = C // reduction_ratio  # = 2

    key = jax.random.PRNGKey(0)
    k1, k2, k3, k4, k5 = jax.random.split(key, 5)
    x = jax.random.normal(k1, (N, C, H, W), jnp.float32)
    # Deterministic synthetic parameters matching nn.Conv2d shapes.
    w1 = jax.random.normal(k2, (hidden, C, 1, 1), jnp.float32) * 0.1
    b1 = jax.random.normal(k3, (hidden,), jnp.float32) * 0.1
    w2 = jax.random.normal(k4, (C, 2 * hidden, 1, 1), jnp.float32) * 0.1
    b2 = jax.random.normal(k5, (C,), jnp.float32) * 0.1

    out = channel_attention(x, w1, b1, w2, b2)
    out = jax.block_until_ready(out)

    ref = reference(x, w1, b1, w2, b2)
    assert out.shape == (N, C, H, W)
    assert jnp.allclose(out, ref, atol=1e-5, rtol=1e-5), "mismatch vs reference"
    print("KERNEL_OK")
</pallas_src>

<mosaic_0001>
module attributes {stable_mosaic.version = 11 : i64} {
  func.func @channel_attention_kernel(%arg0: i32, %arg1: memref<2x32x256xf32, #tpu.memory_space<vmem>>, %arg2: memref<2x32xf32, #tpu.memory_space<vmem>>, %arg3: memref<1x2xf32, #tpu.memory_space<vmem>>, %arg4: memref<2x32xf32, #tpu.memory_space<vmem>>, %arg5: memref<2x32xf32, #tpu.memory_space<vmem>>, %arg6: memref<1x32xf32, #tpu.memory_space<vmem>>, %arg7: memref<2x32x256xf32, #tpu.memory_space<vmem>>) attributes {dimension_semantics = [#tpu.dimension_semantics<parallel>], iteration_bounds = array<i64: 1>, scalar_prefetch = 0 : i64, scratch_operands = 0 : i64, tpu.core_type = #tpu.core_type<tc>, window_params = [{transform_indices = @transform_0, window_bounds = array<i64: 2, 32, 256>}, {pipeline_mode = #tpu.pipeline_mode<synchronous>, transform_indices = @transform_1, window_bounds = array<i64: 2, 32>}, {pipeline_mode = #tpu.pipeline_mode<synchronous>, transform_indices = @transform_2, window_bounds = array<i64: 1, 2>}, {pipeline_mode = #tpu.pipeline_mode<synchronous>, transform_indices = @transform_3, window_bounds = array<i64: 2, 32>}, {pipeline_mode = #tpu.pipeline_mode<synchronous>, transform_indices = @transform_4, window_bounds = array<i64: 2, 32>}, {pipeline_mode = #tpu.pipeline_mode<synchronous>, transform_indices = @transform_5, window_bounds = array<i64: 1, 32>}, {transform_indices = @transform_6, window_bounds = array<i64: 2, 32, 256>}]} {
    %c0 = arith.constant 0 : index
    %c0_0 = arith.constant 0 : index
    %c0_1 = arith.constant 0 : index
    %0 = vector.load %arg1[%c0, %c0_0, %c0_1] : memref<2x32x256xf32, #tpu.memory_space<vmem>>, vector<2x32x256xf32>
    %cst = arith.constant dense<0.000000e+00> : vector<2x32xf32>
    %1 = vector.multi_reduction <add>, %0, %cst [2] : vector<2x32x256xf32> to vector<2x32xf32>
    %cst_2 = arith.constant 3.906250e-03 : f32
    %2 = vector.broadcast %cst_2 : f32 to vector<2x32xf32>
    %3 = arith.mulf %1, %2 : vector<2x32xf32>
    %cst_3 = arith.constant dense<0xFF800000> : vector<2x32xf32>
    %4 = vector.multi_reduction <maximumf>, %0, %cst_3 [2] : vector<2x32x256xf32> to vector<2x32xf32>
    %c0_4 = arith.constant 0 : index
    %c0_5 = arith.constant 0 : index
    %5 = vector.load %arg2[%c0_4, %c0_5] : memref<2x32xf32, #tpu.memory_space<vmem>>, vector<2x32xf32>
    %c0_6 = arith.constant 0 : index
    %c0_7 = arith.constant 0 : index
    %6 = vector.load %arg3[%c0_6, %c0_7] : memref<1x2xf32, #tpu.memory_space<vmem>>, vector<1x2xf32>
    %cst_8 = arith.constant dense<0.000000e+00> : vector<2x2xf32>
    %7 = tpu.matmul %3, %5, %cst_8 {dimension_numbers = #tpu.dot_dimension_numbers<[1], [1], [0], [0], [0, 0, 1, 0], [], []>} : vector<2x32xf32>, vector<2x32xf32>, vector<2x2xf32> -> vector<2x2xf32>
    %8 = vector.broadcast %6 : vector<1x2xf32> to vector<2x2xf32>
    %9 = arith.addf %7, %8 : vector<2x2xf32>
    %cst_9 = arith.constant 0.000000e+00 : f32
    %10 = vector.broadcast %cst_9 : f32 to vector<2x2xf32>
    %11 = arith.maximumf %9, %10 : vector<2x2xf32>
    %cst_10 = arith.constant dense<0.000000e+00> : vector<2x2xf32>
    %12 = tpu.matmul %4, %5, %cst_10 {dimension_numbers = #tpu.dot_dimension_numbers<[1], [1], [0], [0], [0, 0, 1, 0], [], []>} : vector<2x32xf32>, vector<2x32xf32>, vector<2x2xf32> -> vector<2x2xf32>
    %13 = vector.broadcast %6 : vector<1x2xf32> to vector<2x2xf32>
    %14 = arith.addf %12, %13 : vector<2x2xf32>
    %cst_11 = arith.constant 0.000000e+00 : f32
    %15 = vector.broadcast %cst_11 : f32 to vector<2x2xf32>
    %16 = arith.maximumf %14, %15 : vector<2x2xf32>
    %c0_12 = arith.constant 0 : index
    %c0_13 = arith.constant 0 : index
    %17 = vector.load %arg4[%c0_12, %c0_13] : memref<2x32xf32, #tpu.memory_space<vmem>>, vector<2x32xf32>
    %cst_14 = arith.constant dense<0.000000e+00> : vector<2x32xf32>
    %18 = tpu.matmul %11, %17, %cst_14 {dimension_numbers = #tpu.dot_dimension_numbers<[1], [0], [0], [1], [0, 0, 1, 1], [], []>} : vector<2x2xf32>, vector<2x32xf32>, vector<2x32xf32> -> vector<2x32xf32>
    %c0_15 = arith.constant 0 : index
    %c0_16 = arith.constant 0 : index
    %19 = vector.load %arg5[%c0_15, %c0_16] : memref<2x32xf32, #tpu.memory_space<vmem>>, vector<2x32xf32>
    %cst_17 = arith.constant dense<0.000000e+00> : vector<2x32xf32>
    %20 = tpu.matmul %16, %19, %cst_17 {dimension_numbers = #tpu.dot_dimension_numbers<[1], [0], [0], [1], [0, 0, 1, 1], [], []>} : vector<2x2xf32>, vector<2x32xf32>, vector<2x32xf32> -> vector<2x32xf32>
    %21 = arith.addf %18, %20 : vector<2x32xf32>
    %c0_18 = arith.constant 0 : index
    %c0_19 = arith.constant 0 : index
    %22 = vector.load %arg6[%c0_18, %c0_19] : memref<1x32xf32, #tpu.memory_space<vmem>>, vector<1x32xf32>
    %23 = vector.broadcast %22 : vector<1x32xf32> to vector<2x32xf32>
    %24 = arith.addf %21, %23 : vector<2x32xf32>
    %25 = arith.negf %24 : vector<2x32xf32>
    %26 = math.exp %25 : vector<2x32xf32>
    %cst_20 = arith.constant 1.000000e+00 : f32
    %27 = vector.broadcast %cst_20 : f32 to vector<2x32xf32>
    %28 = arith.addf %27, %26 : vector<2x32xf32>
    %29 = arith.divf %27, %28 : vector<2x32xf32>
    %30 = vector.shape_cast %29 : vector<2x32xf32> to vector<2x32x1xf32>
    %31 = vector.broadcast %30 : vector<2x32x1xf32> to vector<2x32x256xf32>
    %32 = arith.mulf %0, %31 : vector<2x32x256xf32>
    %c0_21 = arith.constant 0 : index
    %c0_22 = arith.constant 0 : index
    %c0_23 = arith.constant 0 : index
    %33 = vector.load %arg7[%c0_21, %c0_22, %c0_23] : memref<2x32x256xf32, #tpu.memory_space<vmem>>, vector<2x32x256xf32>
    tpu.vector_store %arg7[%c0_21, %c0_22, %c0_23], %32 {strides = array<i32>} : memref<2x32x256xf32, #tpu.memory_space<vmem>>, vector<2x32x256xf32>,
    return
  }
  func.func @transform_0(%arg0: i32) -> (i32, i32, i32) {
    %c0_i32 = arith.constant 0 : i32
    %c0_i32_0 = arith.constant 0 : i32
    %c0_i32_1 = arith.constant 0 : i32
    return %arg0, %c0_i32, %c0_i32_0 : i32, i32, i32
  }
  func.func @transform_1(%arg0: i32) -> (i32, i32) {
    %c0_i32 = arith.constant 0 : i32
    %c0_i32_0 = arith.constant 0 : i32
    %c0_i32_1 = arith.constant 0 : i32
    return %c0_i32, %c0_i32_0 : i32, i32
  }
  func.func @transform_2(%arg0: i32) -> (i32, i32) {
    %c0_i32 = arith.constant 0 : i32
    %c0_i32_0 = arith.constant 0 : i32
    %c0_i32_1 = arith.constant 0 : i32
    return %c0_i32, %c0_i32_0 : i32, i32
  }
  func.func @transform_3(%arg0: i32) -> (i32, i32) {
    %c0_i32 = arith.constant 0 : i32
    %c0_i32_0 = arith.constant 0 : i32
    %c0_i32_1 = arith.constant 0 : i32
    return %c0_i32, %c0_i32_0 : i32, i32
  }
  func.func @transform_4(%arg0: i32) -> (i32, i32) {
    %c0_i32 = arith.constant 0 : i32
    %c0_i32_0 = arith.constant 0 : i32
    %c0_i32_1 = arith.constant 0 : i32
    return %c0_i32, %c0_i32_0 : i32, i32
  }
  func.func @transform_5(%arg0: i32) -> (i32, i32) {
    %c0_i32 = arith.constant 0 : i32
    %c0_i32_0 = arith.constant 0 : i32
    %c0_i32_1 = arith.constant 0 : i32
    return %c0_i32, %c0_i32_0 : i32, i32
  }
  func.func @transform_6(%arg0: i32) -> (i32, i32, i32) {
    %c0_i32 = arith.constant 0 : i32
    %c0_i32_0 = arith.constant 0 : i32
    %c0_i32_1 = arith.constant 0 : i32
    return %arg0, %c0_i32, %c0_i32_0 : i32, i32, i32
  }
}

</mosaic_0001>

<bundles_post_ra>
// kernel: tpu_custom_call.1
= control target key start
LH: loop header
LB: loop body
LE: loop exit
PB: predicated region body
PF: predicated region fallthrough
CT: control target
= control target key end

     0   :  { %11 = vsyncpa [#allocation3], 0  ;;  %s944_s0 = inlined_call_operand.hbm [shape: f32[2,32,256], index: 0, kind: input, shape index: {}]   ;;  %s945_s1 = inlined_call_operand.hbm [shape: f32[2,32], index: 1, kind: input, shape index: {}]   ;;  %s946_s2 = inlined_call_operand.vmem [shape: f32[1,2], index: 2, kind: input, shape index: {}]   ;;  %s947_s3 = inlined_call_operand.vmem [shape: f32[2,32], index: 3, kind: input, shape index: {}]   ;;  %s948_s4 = inlined_call_operand.vmem [shape: f32[2,32], index: 4, kind: input, shape index: {}]   ;;  %s949_s5 = inlined_call_operand.vmem [shape: f32[1,32], index: 5, kind: input, shape index: {}]   ;;  %s950_s6 = inlined_call_operand.hbm [shape: f32[2,32,256], index: 6, kind: output, shape index: {}]  }
   0x1   :  { %12 = vsyncpa [#allocation6], 0 }
   0x2   :  { %13 = vsyncpa [#allocation4], 0  ;;  %s757_s21 = smov [#allocation2]  }
   0x3   :  { %s19_s22 = sshll.u32 %s757_s21, 4  ;;  %s20_s22 = int_to_ptr.vmem [resolvable:$true] %s19_s22 }
   0x4   :  { %s699_s23 = scalar_lea.vmem %s20_s22, 2048  ;;  %p704_p1 = scmp.lt.s32.totalorder %s20_s22, %s20_s22 }
   0x5   :  { %p700_p0 = scmp.ne.s32.totalorder %s20_s22, %s699_s23  ;;  %p705_p2 = scmp.lt.s32.totalorder %s699_s23, %s699_s23 }
   0x7   :  { %p706_p3 = por %p705_p2, %p704_p1 }
   0x9   :  { %p707_p4 = pnand %p706_p3, %p700_p0 }
   0xb   :  { %710 = shalt.err (!%p707_p4)
}
   0xc   :  { %s758_s24 = smov 256   ;;  %s759_s25 = smov 16  }
   0xd   :  { %25 = dma.hbm_to_vmem [thread:$0]  %s944_s0, 2048, %s20_s22, [#allocation3], %s758_s24, %s758_s24, %s759_s25  }
   0xe   :  { %s760_s28 = smov [#allocation5]  }
   0xf   :  { %s32_s29 = sshll.u32 %s760_s28, 4  ;;  %s33_s29 = int_to_ptr.vmem [resolvable:$true] %s32_s29 }
  0x10   :  { %s719_s30 = scalar_lea.vmem %s33_s29, 32  ;;  %p724_p6 = scmp.lt.s32.totalorder %s33_s29, %s33_s29 }
  0x11   :  { %p720_p5 = scmp.ne.s32.totalorder %s33_s29, %s719_s30  ;;  %p725_p7 = scmp.lt.s32.totalorder %s719_s30, %s719_s30 }
  0x13   :  { %p726_p8 = por %p725_p7, %p724_p6 }
  0x15   :  { %p727_p9 = pnand %p726_p8, %p720_p5 }
  0x17   :  { %730 = shalt.err (!%p727_p9)
}
  0x18   :  { %35 = dma.hbm_to_vmem [thread:$0]  %s945_s1, 32, %s33_s29, [#allocation6]  }
  0x19   :  { %751 = dma.done.wait [#allocation3], 2048  }
  0x1a   :  { %752 = vsyncadd [#allocation3], 4294965248 }
  0x1b   :  { %753 = dma.done.wait [#allocation6], 32  }
  0x1c   :  { %754 = vsyncadd [#allocation6], 4294967264  ;;  %v808_v0 = vld [vmem:[#allocation2 + $0x40] sm:$0xff]  ;;  %v810_v1 = vld [vmem:[#allocation2 + $0x48] sm:$0xff]  ;;  %v761_v32 = vmov 0.0   ;;  %vm186_vm0 = vcmask 261120   ;;  %v138_v34 = vlaneseq }
  0x1d   :  { %v812_v2 = vld [vmem:[#allocation2] sm:$0xff]  ;;  %v78_v3 = vadd.f32 %v810_v1, %v808_v0  ;;  %v816_v4 = vld [vmem:[#allocation2 + $0x8] sm:$0xff]  ;;  %v818_v5 = vld [vmem:[#allocation2 + $0x50] sm:$0xff]  ;;  %v110_v27 = vmax.f32 %v808_v0, %v810_v1  ;;  %660 = vmatprep.subr.mxu0 %v761_v32  ;;  %665 = vmatprep.subr.mxu1 %v761_v32  ;;  %vm762_vm1 = vmmov 0   ;;  %vm149_vm2 = vcmask 130112  }
  0x1e   :  { %v820_v6 = vld [vmem:[#allocation2 + $0x58] sm:$0xff]  ;;  %v66_v7 = vadd.f32 %v816_v4, %v812_v2  ;;  %v824_v8 = vld [vmem:[#allocation2 + $0x10] sm:$0xff]  ;;  %v832_v12 = vld [vmem:[#allocation2 + $0x60] sm:$0xff]  ;;  %v98_v25 = vmax.f32 %v812_v2, %v816_v4  ;;  %662 = vmatprep.mubr.msk.f32.mxu0 %vm762_vm1, %v761_v32  ;;  %667 = vmatprep.mubr.msk.f32.mxu1 %vm762_vm1, %v761_v32  ;;  %v139_v36 = vand.u32 127, %v138_v34  ;;  %v882_v41 = vshrl.u32 %v138_v34, 7 }
  0x1f   :  { %v826_v9 = vld [vmem:[#allocation2 + $0x18] sm:$0xff]  ;;  %79 = vadd.xlane.f32.xlu1 %v78_v3  ;;  %v81_v10 = vadd.f32 %v820_v6, %v818_v5  ;;  %v834_v13 = vld [vmem:[#allocation2 + $0x68] sm:$0xff]  ;;  %v836_v14 = vld [vmem:[#allocation2 + $0x20] sm:$0xff]  ;;  %v113_v26 = vmax.f32 %v818_v5, %v820_v6  ;;  %vm156_vm3 = vcmask 195712   ;;  %vm163_vm4 = vcmask 261312  }
  0x20   :  { %67 = vadd.xlane.f32.xlu0 %v66_v7  ;;  %v69_v11 = vadd.f32 %v826_v9, %v824_v8  ;;  %v838_v15 = vld [vmem:[#allocation2 + $0x28] sm:$0xff]  ;;  %v84_v16 = vadd.f32 %v834_v13, %v832_v12  ;;  %v844_v18 = vld [vmem:[#allocation2 + $0x70] sm:$0xff]  ;;  %v846_v19 = vld [vmem:[#allocation2 + $0x78] sm:$0xff]  ;;  %v101_v24 = vmax.f32 %v824_v8, %v826_v9  ;;  %v116_v28 = vmax.f32 %v832_v12, %v834_v13 }
  0x21   :  { %v72_v17 = vadd.f32 %v838_v15, %v836_v14  ;;  %v848_v20 = vld [vmem:[#allocation2 + $0x30] sm:$0xff]  ;;  %v850_v21 = vld [vmem:[#allocation2 + $0x38] sm:$0xff]  ;;  %v87_v22 = vadd.f32 %v846_v19, %v844_v18  ;;  %v104_v29 = vmax.f32 %v836_v14, %v838_v15  ;;  %v119_v30 = vmax.f32 %v844_v18, %v846_v19  ;;  %v122_v33 = vld [vmem:[#allocation5] sm:$0x3] }
  0x22   :  { %v75_v23 = vadd.f32 %v850_v21, %v848_v20  ;;  %v107_v31 = vmax.f32 %v848_v20, %v850_v21  ;;  %661 = vmatpush3.xpose.msk.msra.mxu0 %vm186_vm0, %v122_v33  ;;  %666 = vmatpush3.xpose.msk.msra.mxu1 %vm186_vm0, %v122_v33  ;;  %v144_v38 = vadd.s32 4294967288, %v139_v36  ;;  %v151_v40 = vadd.s32 4294967280, %v139_v36 }
  0x23   :  { %82 = vadd.xlane.f32.xlu1 %v81_v10  ;;  %670 = vmatprep.subr.mxu0 %v761_v32  ;;  %v158_v45 = vadd.s32 4294967272, %v139_v36  ;;  %v142_v49 = vsub.s32 %v139_v36, %v882_v41  ;;  %vm184_vm5 = vcmask 1041409   ;;  %vm389_vm6 = vcmask 1041408  }
  0x24   :  { %70 = vadd.xlane.f32.xlu0 %v69_v11  ;;  %675 = vmatprep.subr.mxu1 %v761_v32  ;;  %v147_v43 = vsub.s32 %v144_v38, %v882_v41  ;;  %v154_v47 = vsub.s32 %v151_v40, %v882_v41  ;;  %vm385_vm7 = vcmask 15360  }
  0x25   :  { %v161_v56 = vsub.s32 %v158_v45, %v882_v41 }
  0x27   :  { %85 = vadd.xlane.f32.xlu1 %v84_v16 }
  0x28   :  { %73 = vadd.xlane.f32.xlu0 %v72_v17 }
  0x2b   :  { %88 = vadd.xlane.f32.xlu1 %v87_v22 }
  0x2c   :  { %76 = vadd.xlane.f32.xlu0 %v75_v23 }
  0x2f   :  { %102 = vmax.xlane.f32.xlu1 %v101_v24 }
  0x30   :  { %99 = vmax.xlane.f32.xlu0 %v98_v25 }
  0x33   :  { %114 = vmax.xlane.f32.xlu1 %v113_v26 }
  0x34   :  { %111 = vmax.xlane.f32.xlu0 %v110_v27 }
  0x37   :  { %117 = vmax.xlane.f32.xlu1 %v116_v28 }
  0x38   :  { %105 = vmax.xlane.f32.xlu0 %v104_v29 }
  0x3b   :  { %120 = vmax.xlane.f32.xlu1 %v119_v30 }
  0x3c   :  { %108 = vmax.xlane.f32.xlu0 %v107_v31 }
  0xa8   :  { %v80_v35 = vpop.xlane.xlu1 %79 }
  0xa9   :  { %v68_v37 = vpop.xlane.xlu0 %67  ;;  %v94_v50 = vmul.f32 0.00390625, %v80_v35 }
  0xaa   :  { %v90_v53 = vmul.f32 0.00390625, %v68_v37 }
  0xab   :  { %v168_v60 = vrot.slane %v94_v50, %v142_v49 }
  0xac   :  { %v83_v39 = vpop.xlane.xlu1 %82  ;;  %v143_v3 = vrot.slane %v90_v53, %v142_v49 }
  0xad   :  { %v71_v42 = vpop.xlane.xlu0 %70  ;;  %v95_v44 = vmul.f32 0.00390625, %v83_v39 }
  0xae   :  { %v91_v46 = vmul.f32 0.00390625, %v71_v42 }
  0xaf   :  { %v172_v55 = vrot.slane %v95_v44, %v147_v43 }
  0xb0   :  { %v86_v48 = vpop.xlane.xlu1 %85  ;;  %v148_v57 = vrot.slane %v91_v46, %v147_v43 }
  0xb1   :  { %v96_v51 = vmul.f32 0.00390625, %v86_v48  ;;  %v74_v52 = vpop.xlane.xlu0 %73  ;;  %v173_v10 = vsel %vm149_vm2, %v172_v55, %v168_v60 }
  0xb2   :  { %v92_v54 = vmul.f32 0.00390625, %v74_v52  ;;  %v150_v16 = vsel %vm149_vm2, %v148_v57, %v143_v3 }
  0xb3   :  { %v177_v58 = vrot.slane %v96_v51, %v154_v47 }
  0xb4   :  { %v89_v59 = vpop.xlane.xlu1 %88  ;;  %v155_v61 = vrot.slane %v92_v54, %v154_v47  ;;  %v641_v54 = vld [vmem:[%s946_s2] ss:$0 sm:$0xff]  ;;  %s763_s2 = smov [#allocation7]  }
  0xb5   :  { %v97_v62 = vmul.f32 0.00390625, %v89_v59  ;;  %v77_v63 = vpop.xlane.xlu0 %76  ;;  %v178_v17 = vsel %vm156_vm3, %v177_v58, %v173_v10 }
  0xb6   :  { %v93_v7 = vmul.f32 0.00390625, %v77_v63  ;;  %v157_v24 = vsel %vm156_vm3, %v155_v61, %v150_v16 }
  0xb7   :  { %v182_v11 = vrot.slane %v97_v62, %v161_v56 }
  0xb8   :  { %v162_v22 = vrot.slane %v93_v7, %v161_v56  ;;  %v103_v23 = vpop.xlane.xlu1 %102  ;;  %v650_v7 = vld [vmem:[%s949_s5] ss:$0 sm:$0xff]  ;;  %s628_s5 = sshll.u32 %s763_s2, 4  ;;  %s629_s5 = int_to_ptr.vmem [resolvable:$true] %s628_s5 }
  0xb9   :  { %v100_v25 = vpop.xlane.xlu0 %99  ;;  %v183_v26 = vsel %vm163_vm4, %v182_v11, %v178_v17  ;;  %v278_v36 = vrot.slane %v103_v23, %v147_v43  ;;  %s731_s13 = scalar_lea.vmem %s629_s5, 2048  ;;  %p736_p11 = scmp.lt.s32.totalorder %s629_s5, %s629_s5 }
  0xba   :  { %v164_v27 = vsel %vm163_vm4, %v162_v22, %v157_v24  ;;  %v274_v37 = vrot.slane %v100_v25, %v142_v49  ;;  %v555_v24 = vsub.s32 0, %v882_v41  ;;  %p732_p10 = scmp.ne.s32.totalorder %s629_s5, %s731_s13  ;;  %p737_p12 = scmp.lt.s32.totalorder %s731_s13, %s731_s13 }
  0xbb   :  { %v185_v28 = vsel %vm184_vm5, %v183_v26, %v164_v27  ;;  %v574_v27 = vsub.s32 1, %v882_v41 }
  0xbc   :  { %663 = vmatmul.mubr.msk.f32.vlgmr.msra.gmra.mxu0 %vm186_vm0, %v185_v28  ;;  %v115_v29 = vpop.xlane.xlu1 %114  ;;  %v279_v46 = vsel %vm149_vm2, %v278_v36, %v274_v37  ;;  %p738_p13 = por %p737_p12, %p736_p11 }
  0xbd   :  { %v112_v30 = vpop.xlane.xlu0 %111  ;;  %672 = vmatprep.mubr.msk.f32.mxu0 %vm762_vm1, %v761_v32  ;;  %v297_v33 = vrot.slane %v115_v29, %v147_v43 }
  0xbe   :  { %v293_v34 = vrot.slane %v112_v30, %v142_v49  ;;  %v384_v49 = vld [vmem:[%s948_s4] sm:$0x3]  ;;  %p739_p0 = pnand %p738_p13, %p732_p10 }
  0xbf   :  { %671 = vmatpush3.msk.msra.mxu0 %vm389_vm6, %v384_v49 }
  0xc0   :  { %v118_v31 = vpop.xlane.xlu1 %117  ;;  %v298_v42 = vsel %vm149_vm2, %v297_v33, %v293_v34 }
  0xc1   :  { %v106_v35 = vpop.xlane.xlu0 %105  ;;  %v302_v38 = vrot.slane %v118_v31, %v154_v47 }
  0xc2   :  { %v283_v39 = vrot.slane %v106_v35, %v154_v47  ;;  %v383_v47 = vld [vmem:[%s947_s3] sm:$0x3] }
  0xc3   :  { %v303_v48 = vsel %vm156_vm3, %v302_v38, %v298_v42 }
  0xc4   :  { %v121_v40 = vpop.xlane.xlu1 %120  ;;  %v284_v51 = vsel %vm156_vm3, %v283_v39, %v279_v46 }
  0xc5   :  { %v307_v44 = vrot.slane %v121_v40, %v161_v56  ;;  %v109_v45 = vpop.xlane.xlu0 %108 }
  0xc6   :  { %v288_v50 = vrot.slane %v109_v45, %v161_v56 }
  0xc7   :  { %v308_v52 = vsel %vm163_vm4, %v307_v44, %v303_v48 }
  0xc8   :  { %v289_v53 = vsel %vm163_vm4, %v288_v50, %v284_v51 }
  0xc9   :  { %v309_v43 = vsel %vm184_vm5, %v308_v52, %v289_v53 }
  0xca   :  { %668 = vmatmul.mubr.msk.f32.vlgmr.msra.gmra.mxu1 %vm186_vm0, %v309_v43 }
  0xcb   :  { %677 = vmatprep.mubr.msk.f32.mxu1 %vm762_vm1, %v761_v32  ;;  %676 = vmatpush3.msk.msra.mxu1 %vm389_vm6, %v383_v47 }
 0x17c   :  { %v258_v55 = vpop.f32.mrf.mxu0 }
 0x17d   :  { %v259_v56 = vadd.f32 %v641_v54, %v258_v55 }
 0x17e   :  { %v664_v57 = vpop.f32.mrf.mxu0 }
 0x17f   :  { %v262_v32 = vmax.f32 %v259_v56, 0.0 }
 0x181   :  { %678 = vmatmul.mubr.msk.f32.vlgmr.msra.gmra.mxu1 %vm385_vm7, %v262_v32 }
 0x18a   :  { %v378_v58 = vpop.f32.mrf.mxu1 }
 0x18b   :  { %v379_v59 = vadd.f32 %v641_v54, %v378_v58 }
 0x18c   :  { %v669_v60 = vpop.f32.mrf.mxu1 }
 0x18d   :  { %v382_v61 = vmax.f32 %v379_v59, 0.0 }
 0x18f   :  { %673 = vmatmul.mubr.msk.f32.vlgmr.msra.gmra.mxu0 %vm385_vm7, %v382_v61 }
 0x241   :  { %v535_v62 = vpop.f32.mrf.mxu1 }
 0x243   :  { %v679_v63 = vpop.f32.mrf.mxu1 }
 0x24f   :  { %v459_v3 = vpop.f32.mrf.mxu0 }
 0x250   :  { %v536_v10 = vadd.f32 %v535_v62, %v459_v3 }
 0x251   :  { %v674_v11 = vpop.f32.mrf.mxu0 }
 0x252   :  { %v546_v16 = vadd.f32 %v650_v7, %v536_v10 }
 0x254   :  { %v651_v17 = vmul.f32 -1.442695, %v546_v16 }
 0x256   :  { %687 = vpow2.f32 %v651_v17 }
 0x263   :  { %v688_v22 = vpop.eup %687 }
 0x264   :  { %v550_v23 = vadd.f32 1.0, %v688_v22 }
 0x266   :  { %689 = vrcp.f32 %v550_v23 }
 0x273   :  { %v690_v25 = vpop.eup %689 }
 0x274   :  { %v556_v26 = vrot.slane %v690_v25, %v555_v24  ;;  %v575_v28 = vrot.slane %v690_v25, %v574_v27 }
 0x276   :  { %562 = vbcast.lane.b32.xlu1 %v556_v26, 264  ;;  %558 = vbcast.lane.b32.xlu0 %v556_v26, 256 }
 0x27a   :  { %566 = vbcast.lane.b32.xlu1 %v556_v26, 272  ;;  %577 = vbcast.lane.b32.xlu0 %v575_v28, 256 }
 0x27e   :  { %570 = vbcast.lane.b32.xlu1 %v556_v26, 280  ;;  %585 = vbcast.lane.b32.xlu0 %v575_v28, 272 }
 0x282   :  { %581 = vbcast.lane.b32.xlu1 %v575_v28, 264 }
 0x286   :  { %589 = vbcast.lane.b32.xlu1 %v575_v28, 280 }
 0x2e8   :  { %v563_v29 = vpop.permute.xlu1 %562  ;;  %v559_v30 = vpop.permute.xlu0 %558 }
 0x2e9   :  { %v593_v31 = vmul.f32 %v563_v29, %v824_v8  ;;  %v594_v33 = vmul.f32 %v563_v29, %v826_v9  ;;  %v591_v34 = vmul.f32 %v559_v30, %v812_v2  ;;  %v592_v35 = vmul.f32 %v559_v30, %v816_v4 }
 0x2eb   :  { %609 = vst [vmem:[#allocation7 + $0x10] sm:$0xff] %v593_v31  ;;  %610 = vst [vmem:[#allocation7 + $0x18] sm:$0xff] %v594_v33 }
 0x2ec   :  { %607 = vst [vmem:[#allocation7] sm:$0xff] %v591_v34  ;;  %608 = vst [vmem:[#allocation7 + $0x8] sm:$0xff] %v592_v35  ;;  %v567_v41 = vpop.permute.xlu1 %566  ;;  %v578_v36 = vpop.permute.xlu0 %577 }
 0x2ed   :  { %v595_v37 = vmul.f32 %v567_v41, %v836_v14  ;;  %v596_v38 = vmul.f32 %v567_v41, %v838_v15  ;;  %v599_v39 = vmul.f32 %v578_v36, %v808_v0  ;;  %v600_v8 = vmul.f32 %v578_v36, %v810_v1 }
 0x2ef   :  { %611 = vst [vmem:[#allocation7 + $0x20] sm:$0xff] %v595_v37  ;;  %612 = vst [vmem:[#allocation7 + $0x28] sm:$0xff] %v596_v38 }
 0x2f0   :  { %615 = vst [vmem:[#allocation7 + $0x40] sm:$0xff] %v599_v39  ;;  %616 = vst [vmem:[#allocation7 + $0x48] sm:$0xff] %v600_v8  ;;  %v571_v2 = vpop.permute.xlu1 %570  ;;  %v586_v4 = vpop.permute.xlu0 %585 }
 0x2f1   :  { %v597_v9 = vmul.f32 %v571_v2, %v848_v20  ;;  %v598_v40 = vmul.f32 %v571_v2, %v850_v21  ;;  %v603_v42 = vmul.f32 %v586_v4, %v832_v12  ;;  %v604_v14 = vmul.f32 %v586_v4, %v834_v13 }
 0x2f3   :  { %613 = vst [vmem:[#allocation7 + $0x30] sm:$0xff] %v597_v9  ;;  %614 = vst [vmem:[#allocation7 + $0x38] sm:$0xff] %v598_v40 }
 0x2f4   :  { %619 = vst [vmem:[#allocation7 + $0x60] sm:$0xff] %v603_v42  ;;  %620 = vst [vmem:[#allocation7 + $0x68] sm:$0xff] %v604_v14  ;;  %v582_v0 = vpop.permute.xlu1 %581 }
 0x2f5   :  { %v601_v1 = vmul.f32 %v582_v0, %v818_v5  ;;  %v602_v15 = vmul.f32 %v582_v0, %v820_v6 }
 0x2f7   :  { %617 = vst [vmem:[#allocation7 + $0x50] sm:$0xff] %v601_v1  ;;  %618 = vst [vmem:[#allocation7 + $0x58] sm:$0xff] %v602_v15 }
 0x2f8   :  { %v590_v20 = vpop.permute.xlu1 %589 }
 0x2f9   :  { %v605_v21 = vmul.f32 %v590_v20, %v844_v18  ;;  %v606_v12 = vmul.f32 %v590_v20, %v846_v19 }
 0x2fb   :  { %621 = vst [vmem:[#allocation7 + $0x70] sm:$0xff] %v605_v21  ;;  %622 = vst [vmem:[#allocation7 + $0x78] sm:$0xff] %v606_v12 }
 0x2fc   :  { %742 = shalt.err (!%p739_p0)
}
 0x2fd   :  { %634 = dma.vmem_to_hbm [thread:$0]  %s629_s5, 2048, %s950_s6, [#allocation4], %s758_s24, %s758_s24, %s759_s25  }
 0x2fe   :  { %755 = dma.done.wait [#allocation4], 2048  }
 0x2ff   :  { %756 = vsyncadd [#allocation4], 4294965248 }
 0x300   :  { %638 = vsyncpa [#allocation3], 1 }
 0x301   :  { %639 = vsyncpa [#allocation6], 1 }
 0x302   :  { %640 = vsyncpa [#allocation4], 1 }

</bundles_post_ra>
